<compile_context>
chip_gen: v7x
topology: tpu7x:2x2x1
jax: 0.10.0
libtpu: 0.0.40
codegen_flags: <defaults>
</compile_context>

<pallas_src>
import functools

import jax
import jax.numpy as jnp
from jax import lax
from jax.experimental import pallas as pl
from jax.experimental.pallas import tpu as pltpu


def _round_up(x, m):
    return ((x + m - 1) // m) * m


def _pick_block_batch(n, requested):
    """Largest divisor of n that is <= requested, while keeping >=2 grid steps when
    possible so both v7x TensorCores get work under "parallel" semantics."""
    cap = max(1, min(requested, n if n == 1 else n // 2))
    for cand in range(cap, 0, -1):
        if n % cand == 0:
            return cand
    return 1


def _conv_bn_kernel(x_ref, w_ref, shift_ref, o_ref, xpad_ref, *, width, ph):
    """Fused Conv(kh x 1, 'SAME' height pad) + bias + BatchNorm (inference).

    x_ref:     (B, C_in, L)      activations, L = H*W (flattened NCHW spatial), native dtype.
    w_ref:     (kh, C_out, C_in) conv weights pre-scaled by the BN scale (compute dtype).
    shift_ref: (C_out, 1)        fused conv-bias + BN shift (f32).
    o_ref:     (B, C_out, L)     output (f32), lane-dense flattened spatial axis.
    xpad_ref:  (B, C_in, L_scr)  VMEM staging scratch (compute dtype).
    """
    kh = w_ref.shape[0]
    nb, _, L = x_ref.shape

    # Stage the activations into the zero-padded VMEM buffer at lane offset ph*width.
    # Re-zeroed every step: the scratch is per-core and persists across grid steps,
    # so relying on a program_id==0 init would break under megacore splitting.
    # The dtype conversion to the compute dtype happens here, in VMEM, so HBM only
    # ever sees x in its native dtype (no extra HBM round-trip for the cast).
    xpad_ref[...] = jnp.zeros_like(xpad_ref)
    xpad_ref[:, :, pl.ds(ph * width, L)] = x_ref[...].astype(xpad_ref.dtype)

    w = w_ref[...]          # (kh, C_out, C_in)
    shift = shift_ref[...]  # (C_out, 1), f32

    for b in range(nb):                       # B is small & static -> fully unrolled
        acc = None
        for dh in range(kh):                  # kh conv taps = static lane slices
            xs = xpad_ref[b, :, pl.ds(dh * width, L)]                 # (C_in, L)
            z = jnp.dot(w[dh], xs, preferred_element_type=jnp.float32)
            acc = z if acc is None else acc + z
        # Epilogue kept in f32 (v5e has no bf16 VPU); single fused add.
        o_ref[b] = (acc + shift).astype(o_ref.dtype)
        # TODO(synk): fuse the kh dots into one (C_out, kh*C_in) @ (kh*C_in, L) matmul
        # once compute becomes visible (minor while the kernel is overhead/DMA bound).


def conv2d_norm_forward(x, weight, bias, bn_gamma, bn_beta, bn_mean, bn_var, *,
                        stride=(1, 1), padding=None, eps=1e-5,
                        compute_dtype=jnp.bfloat16, block_batch=8):
    """x: (N, C_in, H, W) NCHW. weight: (C_out, C_in, kh, 1). Returns (N, C_out, H, W) f32."""
    N, C_in, H, W = x.shape
    C_out, C_in_w, kh, kw = weight.shape
    assert C_in_w == C_in
    assert kw == 1, "Conv2DNorm uses (kh, 1) kernels"
    if padding is None:                      # module default: 'SAME' -> ((kh-1)//2, 0)
        padding = ((kh - 1) // 2, 0)
    ph, pw = padding
    sh, sw = stride if isinstance(stride, tuple) else (stride, stride)
    assert pw == 0
    # TODO(synk): only stride=(1,1) is implemented (matches the module's test config).
    assert (sh, sw) == (1, 1), "only stride (1, 1) supported"
    # TODO(synk): only 'SAME' height padding (H_out == H) supported in the pad-free path.
    assert 2 * ph == kh - 1, "only 'SAME' height padding supported"

    L = H * W
    bb = _pick_block_batch(N, block_batch)
    L_scr = _round_up((kh - 1) * W + L, 128)     # staging buffer lane extent

    # Free reshape only — no jnp.pad, no transpose, no host-side dtype cast.
    x_flat = x.reshape(N, C_in, L)

    # Fold BatchNorm (inference) + conv bias into the weights / a single shift:
    #   w_fused[dh] = W[:, :, dh, 0] * (gamma * rsqrt(var + eps))
    #   shift       = (bias - mean) * scale + beta
    f32 = jnp.float32
    inv_std = lax.rsqrt(bn_var.astype(f32) + eps)
    scale = bn_gamma.astype(f32) * inv_std                                  # (C_out,)
    w_fused = (weight[:, :, :, 0].astype(f32) * scale[:, None, None]) \
        .transpose(2, 0, 1).astype(compute_dtype)                          # (kh, C_out, C_in)
    shift = ((bias.astype(f32) - bn_mean.astype(f32)) * scale
             + bn_beta.astype(f32)).reshape(C_out, 1)                      # (C_out, 1)

    kernel = functools.partial(_conv_bn_kernel, width=W, ph=ph)

    in_item = jnp.dtype(x.dtype).itemsize
    cost = pl.CostEstimate(
        flops=2 * N * C_out * kh * C_in * L,
        transcendentals=0,
        bytes_accessed=(N * C_in * L * in_item + N * C_out * L * 4
                        + w_fused.size * jnp.dtype(compute_dtype).itemsize + C_out * 4))

    # TODO(synk): add a lane-tiling grid axis over H*W when the per-step footprint
    # (2 x (x block + out block) + staging scratch) approaches the 32 MiB scoped-VMEM
    # budget (v7x has only 64 MiB physical VMEM); not needed at these shapes.
    out = pl.pallas_call(
        kernel,
        out_shape=jax.ShapeDtypeStruct((N, C_out, L), jnp.float32),
        grid_spec=pltpu.PrefetchScalarGridSpec(
            num_scalar_prefetch=0,
            grid=(N // bb,),
            in_specs=[
                pl.BlockSpec((bb, C_in, L), lambda n: (n, 0, 0)),
                pl.BlockSpec((kh, C_out, C_in), lambda n: (0, 0, 0)),
                pl.BlockSpec((C_out, 1), lambda n: (0, 0)),
            ],
            out_specs=pl.BlockSpec((bb, C_out, L), lambda n: (n, 0, 0)),
            scratch_shapes=[pltpu.VMEM((bb, C_in, L_scr), compute_dtype)],
        ),
        compiler_params=pltpu.CompilerParams(
            dimension_semantics=("parallel",),
            vmem_limit_bytes=32 * 1024 * 1024),
        cost_estimate=cost,
    )(x_flat, w_fused, shift)

    # L == H*W exactly -> no padded lanes, no slice: the reshape back to NCHW is free.
    return out.reshape(N, C_out, H, W)


def _reference(x, weight, bias, g, b, mean, var, stride, padding, eps=1e-5):
    y = lax.conv_general_dilated(
        x, weight, window_strides=stride,
        padding=[(padding[0], padding[0]), (padding[1], padding[1])],
        dimension_numbers=("NCHW", "OIHW", "NCHW"))
    y = y + bias.reshape(1, -1, 1, 1)
    inv_std = lax.rsqrt(var + eps)
    return (y - mean.reshape(1, -1, 1, 1)) * (g * inv_std).reshape(1, -1, 1, 1) \
        + b.reshape(1, -1, 1, 1)


if __name__ == "__main__":
    # Module config: in_channels=4, out_channels=8, kernel_size=3 -> [3,1],
    # stride=1, padding='SAME' -> (1, 0), dropout=0.5 (eval: identity),
    # batch_normalization=True, activation=None.
    N, C_in, H, W = 2, 4, 16, 16
    C_out, kh = 8, 3
    stride = (1, 1)
    padding = ((kh - 1) // 2, 0)

    key = jax.random.PRNGKey(0)
    kx, kw_, kb, kg, kbeta, km, kv = jax.random.split(key, 7)
    x = jax.random.normal(kx, (N, C_in, H, W), dtype=jnp.float32)
    weight = jax.random.normal(kw_, (C_out, C_in, kh, 1), dtype=jnp.float32) * 0.1
    bias = jax.random.normal(kb, (C_out,), dtype=jnp.float32) * 0.1
    bn_gamma = 1.0 + 0.1 * jax.random.normal(kg, (C_out,), dtype=jnp.float32)
    bn_beta = 0.1 * jax.random.normal(kbeta, (C_out,), dtype=jnp.float32)
    bn_mean = 0.1 * jax.random.normal(km, (C_out,), dtype=jnp.float32)
    bn_var = jnp.abs(jax.random.normal(kv, (C_out,), dtype=jnp.float32)) + 0.5

    ref = _reference(x, weight, bias, bn_gamma, bn_beta, bn_mean, bn_var,
                     stride, padding)

    # 1) Exact-accuracy path (f32 compute) — tight tolerance.
    fwd_f32 = jax.jit(functools.partial(conv2d_norm_forward, stride=stride,
                                        padding=padding, compute_dtype=jnp.float32))
    out_f32 = jax.block_until_ready(
        fwd_f32(x, weight, bias, bn_gamma, bn_beta, bn_mean, bn_var))
    assert out_f32.shape == (N, C_out, H, W), out_f32.shape
    assert jnp.allclose(out_f32, ref, atol=1e-4, rtol=1e-4), \
        float(jnp.max(jnp.abs(out_f32 - ref)))

    # 2) Default perf path (bf16 matmul operands, f32 accumulate/epilogue).
    fwd = jax.jit(functools.partial(conv2d_norm_forward, stride=stride,
                                    padding=padding))
    out = jax.block_until_ready(
        fwd(x, weight, bias, bn_gamma, bn_beta, bn_mean, bn_var))
    assert out.shape == (N, C_out, H, W), out.shape
    assert jnp.allclose(out, ref, atol=2e-2, rtol=2e-2), \
        float(jnp.max(jnp.abs(out - ref)))

    print("KERNEL_OK")
</pallas_src>

<mosaic_0001>
module attributes {stable_mosaic.version = 11 : i64} {
  func.func @_conv_bn_kernel(%arg0: i32, %arg1: memref<1x4x256xf32, #tpu.memory_space<vmem>>, %arg2: memref<3x8x4xf32, #tpu.memory_space<vmem>>, %arg3: memref<8x1xf32, #tpu.memory_space<vmem>>, %arg4: memref<1x8x256xf32, #tpu.memory_space<vmem>>, %arg5: memref<1x4x384xf32, #tpu.memory_space<vmem>>) attributes {dimension_semantics = [#tpu.dimension_semantics<parallel>], iteration_bounds = array<i64: 2>, scalar_prefetch = 0 : i64, scratch_operands = 1 : i64, tpu.core_type = #tpu.core_type<tc>, window_params = [{transform_indices = @transform_0, window_bounds = array<i64: 1, 4, 256>}, {pipeline_mode = #tpu.pipeline_mode<synchronous>, transform_indices = @transform_1, window_bounds = array<i64: 3, 8, 4>}, {pipeline_mode = #tpu.pipeline_mode<synchronous>, transform_indices = @transform_2, window_bounds = array<i64: 8, 1>}, {transform_indices = @transform_3, window_bounds = array<i64: 1, 8, 256>}]} {
    %cst = arith.constant 0.000000e+00 : f32
    %0 = vector.broadcast %cst : f32 to vector<1x4x384xf32>
    %c0 = arith.constant 0 : index
    %c0_0 = arith.constant 0 : index
    %c0_1 = arith.constant 0 : index
    %1 = vector.load %arg5[%c0, %c0_0, %c0_1] : memref<1x4x384xf32, #tpu.memory_space<vmem>>, vector<1x4x384xf32>
    tpu.vector_store %arg5[%c0, %c0_0, %c0_1], %0 {strides = array<i32>} : memref<1x4x384xf32, #tpu.memory_space<vmem>>, vector<1x4x384xf32>,
    %c0_2 = arith.constant 0 : index
    %c0_3 = arith.constant 0 : index
    %c0_4 = arith.constant 0 : index
    %2 = vector.load %arg1[%c0_2, %c0_3, %c0_4] : memref<1x4x256xf32, #tpu.memory_space<vmem>>, vector<1x4x256xf32>
    %c0_5 = arith.constant 0 : index
    %c0_6 = arith.constant 0 : index
    %c16 = arith.constant 16 : index
    %3 = vector.load %arg5[%c0_5, %c0_6, %c16] : memref<1x4x384xf32, #tpu.memory_space<vmem>>, vector<1x4x256xf32>
    tpu.vector_store %arg5[%c0_5, %c0_6, %c16], %2 {strides = array<i32>} : memref<1x4x384xf32, #tpu.memory_space<vmem>>, vector<1x4x256xf32>,
    %c0_7 = arith.constant 0 : index
    %c0_8 = arith.constant 0 : index
    %c0_9 = arith.constant 0 : index
    %4 = vector.load %arg2[%c0_7, %c0_8, %c0_9] : memref<3x8x4xf32, #tpu.memory_space<vmem>>, vector<3x8x4xf32>
    %c0_10 = arith.constant 0 : index
    %c0_11 = arith.constant 0 : index
    %5 = vector.load %arg3[%c0_10, %c0_11] : memref<8x1xf32, #tpu.memory_space<vmem>>, vector<8x1xf32>
    %c0_12 = arith.constant 0 : index
    %c0_13 = arith.constant 0 : index
    %c0_14 = arith.constant 0 : index
    %6 = vector.load %arg5[%c0_12, %c0_13, %c0_14] : memref<1x4x384xf32, #tpu.memory_space<vmem>>, vector<1x4x256xf32>
    %7 = vector.shape_cast %6 : vector<1x4x256xf32> to vector<4x256xf32>
    %8 = vector.extract_strided_slice %4 {offsets = [0, 0, 0], sizes = [1, 8, 4], strides = [1, 1, 1]} : vector<3x8x4xf32> to vector<1x8x4xf32>
    %9 = vector.shape_cast %8 : vector<1x8x4xf32> to vector<8x4xf32>
    %cst_15 = arith.constant dense<0.000000e+00> : vector<8x256xf32>
    %10 = tpu.matmul %9, %7, %cst_15 {dimension_numbers = #tpu.dot_dimension_numbers<[1], [0], [0], [1], [0, 0, 1, 1], [], []>} : vector<8x4xf32>, vector<4x256xf32>, vector<8x256xf32> -> vector<8x256xf32>
    %c0_16 = arith.constant 0 : index
    %c0_17 = arith.constant 0 : index
    %c16_18 = arith.constant 16 : index
    %11 = vector.load %arg5[%c0_16, %c0_17, %c16_18] : memref<1x4x384xf32, #tpu.memory_space<vmem>>, vector<1x4x256xf32>
    %12 = vector.shape_cast %11 : vector<1x4x256xf32> to vector<4x256xf32>
    %13 = vector.extract_strided_slice %4 {offsets = [1, 0, 0], sizes = [1, 8, 4], strides = [1, 1, 1]} : vector<3x8x4xf32> to vector<1x8x4xf32>
    %14 = vector.shape_cast %13 : vector<1x8x4xf32> to vector<8x4xf32>
    %cst_19 = arith.constant dense<0.000000e+00> : vector<8x256xf32>
    %15 = tpu.matmul %14, %12, %cst_19 {dimension_numbers = #tpu.dot_dimension_numbers<[1], [0], [0], [1], [0, 0, 1, 1], [], []>} : vector<8x4xf32>, vector<4x256xf32>, vector<8x256xf32> -> vector<8x256xf32>
    %16 = arith.addf %10, %15 : vector<8x256xf32>
    %c0_20 = arith.constant 0 : index
    %c0_21 = arith.constant 0 : index
    %c32 = arith.constant 32 : index
    %17 = vector.load %arg5[%c0_20, %c0_21, %c32] : memref<1x4x384xf32, #tpu.memory_space<vmem>>, vector<1x4x256xf32>
    %18 = vector.shape_cast %17 : vector<1x4x256xf32> to vector<4x256xf32>
    %19 = vector.extract_strided_slice %4 {offsets = [2, 0, 0], sizes = [1, 8, 4], strides = [1, 1, 1]} : vector<3x8x4xf32> to vector<1x8x4xf32>
    %20 = vector.shape_cast %19 : vector<1x8x4xf32> to vector<8x4xf32>
    %cst_22 = arith.constant dense<0.000000e+00> : vector<8x256xf32>
    %21 = tpu.matmul %20, %18, %cst_22 {dimension_numbers = #tpu.dot_dimension_numbers<[1], [0], [0], [1], [0, 0, 1, 1], [], []>} : vector<8x4xf32>, vector<4x256xf32>, vector<8x256xf32> -> vector<8x256xf32>
    %22 = arith.addf %16, %21 : vector<8x256xf32>
    %23 = vector.broadcast %5 : vector<8x1xf32> to vector<8x256xf32>
    %24 = arith.addf %22, %23 : vector<8x256xf32>
    %c0_23 = arith.constant 0 : index
    %c0_24 = arith.constant 0 : index
    %c0_25 = arith.constant 0 : index
    %25 = vector.load %arg4[%c0_23, %c0_24, %c0_25] : memref<1x8x256xf32, #tpu.memory_space<vmem>>, vector<1x8x256xf32>
    %26 = vector.shape_cast %25 : vector<1x8x256xf32> to vector<8x256xf32>
    %27 = vector.shape_cast %24 : vector<8x256xf32> to vector<1x8x256xf32>
    tpu.vector_store %arg4[%c0_23, %c0_24, %c0_25], %27 {strides = array<i32>} : memref<1x8x256xf32, #tpu.memory_space<vmem>>, vector<1x8x256xf32>,
    return
  }
  func.func @transform_0(%arg0: i32) -> (i32, i32, i32) {
    %c0_i32 = arith.constant 0 : i32
    %c0_i32_0 = arith.constant 0 : i32
    %c0_i32_1 = arith.constant 0 : i32
    return %arg0, %c0_i32, %c0_i32_0 : i32, i32, i32
  }
  func.func @transform_1(%arg0: i32) -> (i32, i32, i32) {
    %c0_i32 = arith.constant 0 : i32
    %c0_i32_0 = arith.constant 0 : i32
    %c0_i32_1 = arith.constant 0 : i32
    %c0_i32_2 = arith.constant 0 : i32
    return %c0_i32, %c0_i32_0, %c0_i32_1 : i32, i32, i32
  }
  func.func @transform_2(%arg0: i32) -> (i32, i32) {
    %c0_i32 = arith.constant 0 : i32
    %c0_i32_0 = arith.constant 0 : i32
    %c0_i32_1 = arith.constant 0 : i32
    return %c0_i32, %c0_i32_0 : i32, i32
  }
  func.func @transform_3(%arg0: i32) -> (i32, i32, i32) {
    %c0_i32 = arith.constant 0 : i32
    %c0_i32_0 = arith.constant 0 : i32
    %c0_i32_1 = arith.constant 0 : i32
    return %arg0, %c0_i32, %c0_i32_0 : i32, i32, i32
  }
}

</mosaic_0001>

<bundles_post_ra>
// kernel: conv2d_norm_forward.1
= control target key start
LH: loop header
LB: loop body
LE: loop exit
PB: predicated region body
PF: predicated region fallthrough
CT: control target
= control target key end

     0   :  { %s600_s12 = smov 0   ;;  %s642_s0 = inlined_call_operand.vmem [shape: f32[2,4,256], index: 0, kind: input, shape index: {}]   ;;  %s643_s1 = inlined_call_operand.vmem [shape: f32[3,8,4], index: 1, kind: input, shape index: {}]   ;;  %s644_s2 = inlined_call_operand.vmem [shape: f32[8,1], index: 2, kind: input, shape index: {}]   ;;  %s645_s3 = inlined_call_operand.vmem [shape: f32[2,8,256], index: 3, kind: output, shape index: {}]  }
   0x1 LB: > { %s525_s13 = sadd.s32 4294967295, %s573_s12   ;;  %p529_p0 = scmp.ge.s32.totalorder %s573_s12, 1  ;;  %s573_s12 = sphi %s600_s12, %s13_s12  }
   0x2   : > { %p137_p1 = scmp.lt.s32.totalorder %s573_s12, 3 }
   0x4   : > { %p138_p2 = pnand %p529_p0, %p137_p1 }
   0x5   : > { %p161_p3 = scmp.lt.s32.totalorder (!%p138_p2), %s525_s13, 1  ;;  %v575_v0 = vmov (!%p138_p2), 0.0   ;;  %s576_s18 = smov (!%p138_p2), 16   ;;  %vm182_vm0 = vcmask (!%p138_p2), 1043584   ;;  %vm183_vm1 = vcmask (!%p138_p2), 1047556   ;;  %vm178_vm2 = vcmask (!%p138_p2), 130048  }
   0x6   : > { %141 = sbr.rel (%p138_p2) target bundleno = 486 (0x1e6), region = 32  ;;  %171 = vst [vmem:[#allocation2] sm:$0xff] (!%p138_p2), %v575_v0  ;;  %172 = vst [vmem:[#allocation2 + $0x8] sm:$0xf] (!%p138_p2), %v575_v0  ;;  %360 = vmatprep.mubr.f32.mxu0 (!%p138_p2), %v575_v0  ;;  %280 = vmatprep.mubr.f32.mxu1 (!%p138_p2), %v575_v0  ;;  %vm186_vm3 = vcmask (!%p138_p2), 125952   ;;  %v577_v5 = vmov (!%p138_p2), 0  }
   0x7   : > { %vm184_vm4 = vmor (!%p138_p2), %vm183_vm1, %vm182_vm0  ;;  %564 = vset.pattern.permute.xlu1 (!%p138_p2), %v577_v5  ;;  %565 = vset.pattern.permute.xlu0 (!%p138_p2), %v577_v5  ;;  %s578_s19 = smov (!%p138_p2), 96   ;;  %s579_s20 = smov (!%p138_p2), 112   ;;  %vm211_vm5 = vcmask (!%p138_p2), 1043456   ;;  %v188_v10 = vld [vmem:[%s643_s1] sm:$0xff] (!%p138_p2)  ;;  %vm207_vm6 = vcmask (!%p138_p2), 31744   ;;  %vm378_vm7 = vcmask (!%p138_p2), 785408  }
   0x8   : > { %v191_v11 = vld [vmem:[%s644_s2] sm:$0xff] (!%p138_p2)  ;;  %vm204_vm8 = vcmask (!%p138_p2), 916480   ;;  %v189_v20 = vld [vmem:[%s643_s1 + $0x8] sm:$0xff] (!%p138_p2)  ;;  %v190_v21 = vld [vmem:[%s643_s1 + $0x10] sm:$0xff] (!%p138_p2) }
   0xd   : > { %s647_s13 = smov (!%p161_p3, %s525_s13), 1 }
   0xe   : > { %s545_s14 = sshll.u32 %s647_s13, 3  ;;  %s546_s29 = sshll.u32 %s647_s13, 4 }
   0xf   : > { %s165_s17 = scalar_lea.vmem %s642_s0, %s545_s14  ;;  %s170_s5 = scalar_lea.vmem %s645_s3, %s546_s29 }
  0x10   : > { %v173_v1 = vld [vmem:[%s165_s17] sm:$0xff] }
  0x11   : > { %175 = vrot.lane.b32.xlu0 %v173_v1, %s576_s18 }
  0x83   : > { %v176_v2 = vpop.permute.xlu0 %175 }
  0x84   : > { %v177_v3 = vrot.slane %v176_v2, 4 }
  0x86   : > { %v179_v4 = vsel %vm178_vm2, %v177_v3, %v176_v2  ;;  %187 = vst.msk [vmem:[#allocation2 + $0x8] sm:$0xf] %vm186_vm3, %v177_v3 }
  0x87   : > { %185 = vst.msk [vmem:[#allocation2] sm:$0xff] %vm184_vm4, %v179_v4 }
  0x8d   : > { %v368_v6 = vld [vmem:[#allocation2 + $0x8] sm:$0xf] }
  0x8e   : > { %v194_v7 = vld [vmem:[#allocation2 + $0x8] sm:$0xf]  ;;  %376 = vrot.lane.b32.xlu0 %v368_v6, %s578_s19  ;;  %v192_v8 = vld [vmem:[#allocation2] sm:$0xff] }
  0x8f   : > { %202 = vrot.lane.b32.xlu1 %v194_v7, %s579_s20  ;;  %v288_v9 = vcombine.high %v192_v8, %v192_v8 }
  0x91   : > { %537 = vmatprep.subr.msk.mxu0 %vm211_vm5, %v288_v9 }
  0x92   : > { %200 = vrot.lane.b32.xlu0 %v288_v9, %s579_s20  ;;  %538 = vmatpush1.msk.msra.mxu0 %vm211_vm5, %v192_v8 }
  0x93   : > { %374 = vrot.lane.b32.xlu1 %v288_v9, %s578_s19  ;;  %539 = vmatmul.mubr.msk.f32.vlgmr.msra.gmra.mrb[0].mxu0 %vm207_vm6, %v188_v10 }
  0x94   : > { %452 = vmatprep.mubr.f32.mxu0 %v575_v0 }
  0x96   : > { %372 = vrot.lane.b32.xlu0 %v192_v8, %s578_s19 }
  0x97   : > { %198 = vrot.lane.b32.xlu1 %v192_v8, %s579_s20 }
  0x9b   : > { %463 = vperm.xlu1 %564, %v191_v11  }
 0x100   : > { %v377_v12 = vpop.permute.xlu0 %376 }
 0x101   : > { %v203_v13 = vpop.permute.xlu1 %202 }
 0x104   : > { %v201_v15 = vpop.permute.xlu0 %200 }
 0x105   : > { %v375_v14 = vpop.permute.xlu1 %374  ;;  %v206_v17 = vsel %vm204_vm8, %v201_v15, %v203_v13 }
 0x106   : > { %v380_v16 = vsel %vm378_vm7, %v375_v14, %v377_v12  ;;  %534 = vmatprep.subr.msk.mxu1 %vm211_vm5, %v206_v17 }
 0x107   : > { %540 = vmatprep.subr.msk.mxu0 %vm211_vm5, %v380_v16 }
 0x108   : > { %v373_v19 = vpop.permute.xlu0 %372 }
 0x109   : > { %v199_v18 = vpop.permute.xlu1 %198  ;;  %v379_v22 = vsel %vm378_vm7, %v373_v19, %v375_v14 }
 0x10a   : > { %v205_v23 = vsel %vm204_vm8, %v199_v18, %v201_v15  ;;  %541 = vmatpush1.msk.msra.mxu0 %vm211_vm5, %v379_v22 }
 0x10b   : > { %535 = vmatpush1.msk.msra.mxu1 %vm211_vm5, %v205_v23  ;;  %542 = vmatmul.mubr.msk.f32.vlgmr.msra.gmra.mrb[0].mxu0 %vm207_vm6, %v190_v21 }
 0x10c   : > { %536 = vmatmul.mubr.msk.f32.vlgmr.msra.gmra.mrb[0].mxu1 %vm207_vm6, %v189_v20 }
 0x11a   : > { %v464_v24 = vpop.permute.xlu1 %463 }
 0x1de   : > { %v454_v26 = vpop.f32.mrb[0].mxu0 }
 0x1df   : > { %v282_v25 = vpop.f32.mrb[0].mxu1  ;;  %v456_v29 = vpop.f32.mrb[1].mxu0 }
 0x1e0   : > { %v547_v27 = vadd.f32 %v454_v26, %v282_v25  ;;  %v284_v28 = vpop.f32.mrb[1].mxu1 }
 0x1e1   : > { %v548_v30 = vadd.f32 %v456_v29, %v284_v28 }
 0x1e2   : > { %v466_v31 = vadd.f32 %v547_v27, %v464_v24 }
 0x1e3   : > { %v467_v32 = vadd.f32 %v548_v30, %v464_v24 }
 0x1e4   : > { %468 = vst [vmem:[%s170_s5] sm:$0xff] %v466_v31 }
 0x1e5   : > { %469 = vst [vmem:[%s170_s5 + $0x8] sm:$0xff] %v467_v32 }
 0x1e6 PF: > { %s13_s12 = sadd.s32 1, %s573_s12  }
 0x1e7   : > { %p10_p4 = scmp.ge.s32.totalorder %s13_s12, 4  }
 0x1e9   :  { %12 = sbr.rel (!%p10_p4) target bundleno = 1 (0x1), region = 62 }

</bundles_post_ra>
